<compile_context>
chip_gen: v7x
topology: tpu7x:2x2x1
jax: 0.10.0
libtpu: 0.0.40
codegen_flags: <defaults>
</compile_context>

<pallas_src>
import functools

import jax
import jax.numpy as jnp
from jax.experimental import pallas as pl
from jax.experimental.pallas import tpu as pltpu

LANES = 128
HID_PAD = 128  # hidden dims 110 / 116 / 121 all pad to a single 128-lane tile


def _round_up(n, m):
    return ((n + m - 1) // m) * m


def mlp_kernel(x_ref, w1_ref, w_ref, b_ref, w4_ref, o_ref):
    # x_ref:  (TB, Dp)           bf16 input tile (Dp = D rounded up to 8)
    # w1_ref: (Dp, 128)          bf16 layer-1 weight              (resident)
    # w_ref:  (2, 128, 128)      bf16 layer-2/3 weights, stacked  (resident)
    # b_ref:  (4, 1, 128)        f32 biases (b4 replicated on all lanes)
    # w4_ref: (1, 128)           f32 layer-4 weight column, zero-padded
    # o_ref:  (1, TB//128, 128)  f32 lane-dense packed output
    h = jnp.dot(x_ref[...], w1_ref[...], preferred_element_type=jnp.float32)
    h = jnp.maximum(h + b_ref[0], 0.0)
    for i in range(2):  # layers 2 and 3 (with ReLU); bf16 MXU, f32 accumulate
        h = jnp.dot(h.astype(jnp.bfloat16), w_ref[i],
                    preferred_element_type=jnp.float32)
        h = jnp.maximum(h + b_ref[i + 1], 0.0)

    # Layer 4 (121 -> 1), no ReLU.  Instead of an MXU matmul against a weight
    # matrix whose columns are 127/128 zeros, do an exact f32 elementwise
    # multiply (VPU) + lane reduction (XLU) on a 128-row-grouped view so the
    # per-row scalar outputs land lane-dense: out[g, l] = row g*128 + l.
    tb = h.shape[0]
    t = h * w4_ref[...]                                   # (TB, 128) f32
    t3 = t.reshape(tb // LANES, LANES, LANES)             # sublane regroup only
    out = jnp.sum(t3, axis=-1) + b_ref[3]                 # (TB//128, 128)
    o_ref[0] = out.astype(o_ref.dtype)


def pack_params(params, input_dim):
    """Zero-pad, stack and cast (w, b) params for the kernel.

    params: 4 tuples (w, b); w is (in, out), b is (1, out), float32.
    Returns:
      w1_p   (Dp, 128)      bf16
      w_rest (2, 128, 128)  bf16   (layers 2, 3)
      b_all  (4, 1, 128)    f32    (b4 replicated across all lanes)
      w4_p   (1, 128)       f32    (layer-4 column, zero padded)
    """
    d_pad = _round_up(input_dim, 8)
    (w1, b1), (w2, b2), (w3, b3), (w4, b4) = params

    w1_p = (jnp.zeros((d_pad, HID_PAD), jnp.float32)
            .at[: w1.shape[0], : w1.shape[1]].set(w1)).astype(jnp.bfloat16)

    w_rest = []
    for w in (w2, w3):
        fi, fo = w.shape
        w_rest.append(jnp.zeros((HID_PAD, HID_PAD), jnp.float32).at[:fi, :fo].set(w))
    w_rest = jnp.stack(w_rest).astype(jnp.bfloat16)

    biases = []
    for b in (b1, b2, b3):
        biases.append(jnp.zeros((1, HID_PAD), jnp.float32).at[:, : b.shape[1]].set(b))
    # Layer-4 bias: every lane of the packed output is a distinct batch row's
    # scalar output, so the scalar bias is replicated across all 128 lanes.
    biases.append(jnp.full((1, HID_PAD), b4[0, 0], jnp.float32))
    b_all = jnp.stack(biases)

    w4_p = jnp.zeros((1, HID_PAD), jnp.float32).at[0, : w4.shape[0]].set(w4[:, 0])
    return w1_p, w_rest, b_all, w4_p


@functools.partial(jax.jit, static_argnames=("block_batch",))
def mlp_forward(x, w1_p, w_rest, b_all, w4_p, *, block_batch=1024):
    B, D = x.shape
    d_pad = w1_p.shape[0]

    # Batch tiling over 128-row groups.  Keep >=2 grid steps when possible so
    # the "parallel" axis shards across both TensorCores on v7x, and size the
    # tile from ceil-divided groups to keep padding waste small.
    n_groups = pl.cdiv(max(B, 1), LANES)
    max_groups = max(block_batch // LANES, 1)
    steps = pl.cdiv(n_groups, max_groups)
    if n_groups >= 2:
        steps = max(steps, 2)
    groups = pl.cdiv(n_groups, steps)     # 128-row groups per tile
    tb = groups * LANES                   # rows per tile
    b_pad = steps * tb

    # Pad batch rows (and K only up to a multiple of 8) and cast to bf16.
    # No K-pad to 128: the MXU handles K=D directly.
    x_p = (jnp.zeros((b_pad, d_pad), jnp.bfloat16)
           .at[:B, :D].set(x.astype(jnp.bfloat16)))

    out_packed = pl.pallas_call(
        mlp_kernel,
        out_shape=jax.ShapeDtypeStruct((steps, groups, LANES), jnp.float32),
        grid=(steps,),
        in_specs=[
            pl.BlockSpec((tb, d_pad), lambda i: (i, 0)),
            pl.BlockSpec((d_pad, HID_PAD), lambda i: (0, 0)),           # resident
            pl.BlockSpec((2, HID_PAD, HID_PAD), lambda i: (0, 0, 0)),   # resident
            pl.BlockSpec((4, 1, HID_PAD), lambda i: (0, 0, 0)),         # resident
            pl.BlockSpec((1, HID_PAD), lambda i: (0, 0)),               # resident
        ],
        out_specs=pl.BlockSpec((1, groups, LANES), lambda i: (i, 0, 0)),
        compiler_params=pltpu.CompilerParams(
            dimension_semantics=("parallel",)),
    )(x_p, w1_p, w_rest, b_all, w4_p)

    # Packed element (s, g, l) is the output of row s*tb + g*128 + l.
    return out_packed.reshape(b_pad, 1)[:B]


def init_params(key, input_dim):
    """Deterministic init mirroring PyTorch nn.Linear (uniform +/- 1/sqrt(fan_in))."""
    dims = [(input_dim, 110), (110, 116), (116, 121), (121, 1)]
    params = []
    for (fan_in, fan_out) in dims:
        key, kw, kb = jax.random.split(key, 3)
        bound = 1.0 / jnp.sqrt(jnp.float32(fan_in))
        w = jax.random.uniform(kw, (fan_in, fan_out), jnp.float32, -bound, bound)
        b = jax.random.uniform(kb, (1, fan_out), jnp.float32, -bound, bound)
        params.append((w, b))
    return params


def reference_forward(x, params):
    """Plain-JAX reference mirroring the kernel numerics:
    bf16 matmul operands with f32 accumulation for layers 1-3, exact f32 for
    the final 121->1 layer."""
    h = x
    for (w, b) in params[:3]:
        h = jnp.dot(h.astype(jnp.bfloat16), w.astype(jnp.bfloat16),
                    preferred_element_type=jnp.float32) + b
        h = jnp.maximum(h, 0.0)
    w4, b4 = params[3]
    return jnp.dot(h, w4, precision=jax.lax.Precision.HIGHEST) + b4


if __name__ == "__main__":
    key = jax.random.PRNGKey(0)
    key, kx1, kx2 = jax.random.split(key, 3)

    input_dim = 32
    params = init_params(key, input_dim)
    w1_p, w_rest, b_all, w4_p = pack_params(params, input_dim)

    # Small batch (single 128-row tile, single grid step).
    x_small = jax.random.normal(kx1, (8, input_dim), jnp.float32)
    out_small = jax.block_until_ready(mlp_forward(x_small, w1_p, w_rest, b_all, w4_p))
    ref_small = reference_forward(x_small, params)
    assert out_small.shape == (8, 1)
    assert jnp.allclose(out_small, ref_small, atol=1e-2, rtol=1e-2)

    # Larger non-multiple batch exercising multiple grid steps + row padding
    # + packed-output reassembly.
    x_big = jax.random.normal(kx2, (300, input_dim), jnp.float32)
    out_big = jax.block_until_ready(mlp_forward(x_big, w1_p, w_rest, b_all, w4_p))
    ref_big = reference_forward(x_big, params)
    assert out_big.shape == (300, 1)
    assert jnp.allclose(out_big, ref_big, atol=1e-2, rtol=1e-2)

    print("KERNEL_OK")
</pallas_src>

<mosaic_0001>
module attributes {stable_mosaic.version = 11 : i64} {
  func.func @mlp_kernel(%arg0: i32, %arg1: memref<128x32xbf16, #tpu.memory_space<vmem>>, %arg2: memref<32x128xbf16, #tpu.memory_space<vmem>>, %arg3: memref<2x128x128xbf16, #tpu.memory_space<vmem>>, %arg4: memref<4x1x128xf32, #tpu.memory_space<vmem>>, %arg5: memref<1x128xf32, #tpu.memory_space<vmem>>, %arg6: memref<1x1x128xf32, #tpu.memory_space<vmem>>) attributes {dimension_semantics = [#tpu.dimension_semantics<parallel>], iteration_bounds = array<i64: 1>, scalar_prefetch = 0 : i64, scratch_operands = 0 : i64, tpu.core_type = #tpu.core_type<tc>, window_params = [{transform_indices = @transform_0, window_bounds = array<i64: 128, 32>}, {pipeline_mode = #tpu.pipeline_mode<synchronous>, transform_indices = @transform_1, window_bounds = array<i64: 32, 128>}, {pipeline_mode = #tpu.pipeline_mode<synchronous>, transform_indices = @transform_2, window_bounds = array<i64: 2, 128, 128>}, {pipeline_mode = #tpu.pipeline_mode<synchronous>, transform_indices = @transform_3, window_bounds = array<i64: 4, 1, 128>}, {pipeline_mode = #tpu.pipeline_mode<synchronous>, transform_indices = @transform_4, window_bounds = array<i64: 1, 128>}, {transform_indices = @transform_5, window_bounds = array<i64: 1, 1, 128>}]} {
    %c0 = arith.constant 0 : index
    %c0_0 = arith.constant 0 : index
    %0 = vector.load %arg1[%c0, %c0_0] : memref<128x32xbf16, #tpu.memory_space<vmem>>, vector<128x32xbf16>
    %c0_1 = arith.constant 0 : index
    %c0_2 = arith.constant 0 : index
    %1 = vector.load %arg2[%c0_1, %c0_2] : memref<32x128xbf16, #tpu.memory_space<vmem>>, vector<32x128xbf16>
    %cst = arith.constant dense<0.000000e+00> : vector<128x128xf32>
    %2 = tpu.matmul %0, %1, %cst {dimension_numbers = #tpu.dot_dimension_numbers<[1], [0], [0], [1], [0, 0, 1, 1], [], []>} : vector<128x32xbf16>, vector<32x128xbf16>, vector<128x128xf32> -> vector<128x128xf32>
    %c0_3 = arith.constant 0 : index
    %c0_4 = arith.constant 0 : index
    %c0_5 = arith.constant 0 : index
    %3 = vector.load %arg4[%c0_3, %c0_4, %c0_5] : memref<4x1x128xf32, #tpu.memory_space<vmem>>, vector<1x1x128xf32>
    %4 = vector.shape_cast %3 : vector<1x1x128xf32> to vector<1x128xf32>
    %5 = vector.broadcast %4 : vector<1x128xf32> to vector<128x128xf32>
    %6 = arith.addf %2, %5 : vector<128x128xf32>
    %cst_6 = arith.constant 0.000000e+00 : f32
    %7 = vector.broadcast %cst_6 : f32 to vector<128x128xf32>
    %8 = arith.maximumf %6, %7 : vector<128x128xf32>
    %9 = arith.truncf %8 : vector<128x128xf32> to vector<128x128xbf16>
    %c0_7 = arith.constant 0 : index
    %c0_8 = arith.constant 0 : index
    %c0_9 = arith.constant 0 : index
    %10 = vector.load %arg3[%c0_7, %c0_8, %c0_9] : memref<2x128x128xbf16, #tpu.memory_space<vmem>>, vector<1x128x128xbf16>
    %11 = vector.shape_cast %10 : vector<1x128x128xbf16> to vector<128x128xbf16>
    %cst_10 = arith.constant dense<0.000000e+00> : vector<128x128xf32>
    %12 = tpu.matmul %9, %11, %cst_10 {dimension_numbers = #tpu.dot_dimension_numbers<[1], [0], [0], [1], [0, 0, 1, 1], [], []>} : vector<128x128xbf16>, vector<128x128xbf16>, vector<128x128xf32> -> vector<128x128xf32>
    %c1 = arith.constant 1 : index
    %c0_11 = arith.constant 0 : index
    %c0_12 = arith.constant 0 : index
    %13 = vector.load %arg4[%c1, %c0_11, %c0_12] : memref<4x1x128xf32, #tpu.memory_space<vmem>>, vector<1x1x128xf32>
    %14 = vector.shape_cast %13 : vector<1x1x128xf32> to vector<1x128xf32>
    %15 = vector.broadcast %14 : vector<1x128xf32> to vector<128x128xf32>
    %16 = arith.addf %12, %15 : vector<128x128xf32>
    %cst_13 = arith.constant 0.000000e+00 : f32
    %17 = vector.broadcast %cst_13 : f32 to vector<128x128xf32>
    %18 = arith.maximumf %16, %17 : vector<128x128xf32>
    %19 = arith.truncf %18 : vector<128x128xf32> to vector<128x128xbf16>
    %c1_14 = arith.constant 1 : index
    %c0_15 = arith.constant 0 : index
    %c0_16 = arith.constant 0 : index
    %20 = vector.load %arg3[%c1_14, %c0_15, %c0_16] : memref<2x128x128xbf16, #tpu.memory_space<vmem>>, vector<1x128x128xbf16>
    %21 = vector.shape_cast %20 : vector<1x128x128xbf16> to vector<128x128xbf16>
    %cst_17 = arith.constant dense<0.000000e+00> : vector<128x128xf32>
    %22 = tpu.matmul %19, %21, %cst_17 {dimension_numbers = #tpu.dot_dimension_numbers<[1], [0], [0], [1], [0, 0, 1, 1], [], []>} : vector<128x128xbf16>, vector<128x128xbf16>, vector<128x128xf32> -> vector<128x128xf32>
    %c2 = arith.constant 2 : index
    %c0_18 = arith.constant 0 : index
    %c0_19 = arith.constant 0 : index
    %23 = vector.load %arg4[%c2, %c0_18, %c0_19] : memref<4x1x128xf32, #tpu.memory_space<vmem>>, vector<1x1x128xf32>
    %24 = vector.shape_cast %23 : vector<1x1x128xf32> to vector<1x128xf32>
    %25 = vector.broadcast %24 : vector<1x128xf32> to vector<128x128xf32>
    %26 = arith.addf %22, %25 : vector<128x128xf32>
    %cst_20 = arith.constant 0.000000e+00 : f32
    %27 = vector.broadcast %cst_20 : f32 to vector<128x128xf32>
    %28 = arith.maximumf %26, %27 : vector<128x128xf32>
    %c0_21 = arith.constant 0 : index
    %c0_22 = arith.constant 0 : index
    %29 = vector.load %arg5[%c0_21, %c0_22] : memref<1x128xf32, #tpu.memory_space<vmem>>, vector<1x128xf32>
    %30 = vector.broadcast %29 : vector<1x128xf32> to vector<128x128xf32>
    %31 = arith.mulf %28, %30 : vector<128x128xf32>
    %32 = vector.shape_cast %31 : vector<128x128xf32> to vector<1x128x128xf32>
    %cst_23 = arith.constant dense<0.000000e+00> : vector<1x128xf32>
    %33 = vector.multi_reduction <add>, %32, %cst_23 [2] : vector<1x128x128xf32> to vector<1x128xf32>
    %c3 = arith.constant 3 : index
    %c0_24 = arith.constant 0 : index
    %c0_25 = arith.constant 0 : index
    %34 = vector.load %arg4[%c3, %c0_24, %c0_25] : memref<4x1x128xf32, #tpu.memory_space<vmem>>, vector<1x1x128xf32>
    %35 = vector.shape_cast %34 : vector<1x1x128xf32> to vector<1x128xf32>
    %36 = arith.addf %33, %35 : vector<1x128xf32>
    %c0_26 = arith.constant 0 : index
    %c0_27 = arith.constant 0 : index
    %c0_28 = arith.constant 0 : index
    %37 = vector.load %arg6[%c0_26, %c0_27, %c0_28] : memref<1x1x128xf32, #tpu.memory_space<vmem>>, vector<1x1x128xf32>
    %38 = vector.shape_cast %37 : vector<1x1x128xf32> to vector<1x128xf32>
    %39 = vector.shape_cast %36 : vector<1x128xf32> to vector<1x1x128xf32>
    tpu.vector_store %arg6[%c0_26, %c0_27, %c0_28], %39 {strides = array<i32>} : memref<1x1x128xf32, #tpu.memory_space<vmem>>, vector<1x1x128xf32>,
    return
  }
  func.func @transform_0(%arg0: i32) -> (i32, i32) {
    %c0_i32 = arith.constant 0 : i32
    %c0_i32_0 = arith.constant 0 : i32
    return %arg0, %c0_i32 : i32, i32
  }
  func.func @transform_1(%arg0: i32) -> (i32, i32) {
    %c0_i32 = arith.constant 0 : i32
    %c0_i32_0 = arith.constant 0 : i32
    %c0_i32_1 = arith.constant 0 : i32
    return %c0_i32, %c0_i32_0 : i32, i32
  }
  func.func @transform_2(%arg0: i32) -> (i32, i32, i32) {
    %c0_i32 = arith.constant 0 : i32
    %c0_i32_0 = arith.constant 0 : i32
    %c0_i32_1 = arith.constant 0 : i32
    %c0_i32_2 = arith.constant 0 : i32
    return %c0_i32, %c0_i32_0, %c0_i32_1 : i32, i32, i32
  }
  func.func @transform_3(%arg0: i32) -> (i32, i32, i32) {
    %c0_i32 = arith.constant 0 : i32
    %c0_i32_0 = arith.constant 0 : i32
    %c0_i32_1 = arith.constant 0 : i32
    %c0_i32_2 = arith.constant 0 : i32
    return %c0_i32, %c0_i32_0, %c0_i32_1 : i32, i32, i32
  }
  func.func @transform_4(%arg0: i32) -> (i32, i32) {
    %c0_i32 = arith.constant 0 : i32
    %c0_i32_0 = arith.constant 0 : i32
    %c0_i32_1 = arith.constant 0 : i32
    return %c0_i32, %c0_i32_0 : i32, i32
  }
  func.func @transform_5(%arg0: i32) -> (i32, i32, i32) {
    %c0_i32 = arith.constant 0 : i32
    %c0_i32_0 = arith.constant 0 : i32
    %c0_i32_1 = arith.constant 0 : i32
    return %arg0, %c0_i32, %c0_i32_0 : i32, i32, i32
  }
}

</mosaic_0001>

<bundles_post_ra>
// kernel: mlp_forward.1
= control target key start
LH: loop header
LB: loop body
LE: loop exit
PB: predicated region body
PF: predicated region fallthrough
CT: control target
= control target key end

     0   :  { %10 = vsyncpa [#allocation3], 0  ;;  %s1202_s18 = smov [#allocation2]   ;;  %s1394_s0 = inlined_call_operand.vmem [shape: bf16[128,32], index: 0, kind: input, shape index: {}]   ;;  %s1395_s1 = inlined_call_operand.vmem [shape: bf16[32,128], index: 1, kind: input, shape index: {}]   ;;  %s1396_s2 = inlined_call_operand.hbm [shape: bf16[2,128,128], index: 2, kind: input, shape index: {}]   ;;  %s1397_s3 = inlined_call_operand.vmem [shape: f32[4,1,128], index: 3, kind: input, shape index: {}]   ;;  %s1398_s4 = inlined_call_operand.vmem [shape: f32[1,128], index: 4, kind: input, shape index: {}]   ;;  %s1399_s5 = inlined_call_operand.vmem [shape: f32[1,1,128], index: 5, kind: output, shape index: {}]  }
   0x1   :  { %s20_s19 = sshll.u32 %s1202_s18, 4  ;;  %s1178_s22 = scalar_lea.hbm %s1396_s2, 2048  ;;  %s21_s19 = int_to_ptr.vmem [resolvable:$true] %s20_s19 }
   0x2   :  { %p1179_p0 = scmp.ne.s32.totalorder %s1396_s2, %s1178_s22  ;;  %p1182_p1 = scmp.lt.u32.totalorder %s1178_s22, %s1396_s2 }
   0x4   :  { %p1184_p2 = pnand %p1182_p1, %p1179_p0 }
   0x6   :  { %1187 = shalt.err (!%p1184_p2)
}
   0x7   :  { %s1188_s27 = scalar_lea.vmem %s21_s19, 2048  ;;  %p1193_p4 = scmp.lt.s32.totalorder %s21_s19, %s21_s19 }
   0x8   :  { %p1189_p3 = scmp.ne.s32.totalorder %s21_s19, %s1188_s27  ;;  %p1194_p5 = scmp.lt.s32.totalorder %s1188_s27, %s1188_s27 }
   0xa   :  { %p1195_p6 = por %p1194_p5, %p1193_p4 }
   0xc   :  { %p1196_p7 = pnand %p1195_p6, %p1189_p3 }
   0xe   :  { %1199 = shalt.err (!%p1196_p7)
}
   0xf   :  { %s1203_s28 = smov 64   ;;  %s1204_s29 = smov 4  }
  0x10   :  { %26 = dma.hbm_to_vmem [thread:$0]  %s1396_s2, 2048, %s21_s19, [#allocation3], %s1203_s28, %s1203_s28, %s1204_s29  }
  0x11   :  { %1200 = dma.done.wait [#allocation3], 2048  }
  0x12   :  { %1201 = vsyncadd [#allocation3], 4294965248  ;;  %v1152_v0 = vld [vmem:[%s1395_s1] sm:$0xff]   ;;  %v1153_v1 = vld [vmem:[%s1395_s1 + $0x8] sm:$0xff]   ;;  %vm114_vm0 = vcmask 261120   ;;  %vm871_vm1 = vcmask 130112  }
  0x13   :  { %1062 = vmatprep.subr.bf16.mxu0 %v1152_v0  ;;  %v1154_v2 = vld [vmem:[%s1394_s0] sm:$0xff]   ;;  %v1155_v3 = vld [vmem:[%s1394_s0 + $0x8] sm:$0xff]   ;;  %v1156_v4 = vld [vmem:[%s1394_s0 + $0x10] sm:$0xff]   ;;  %vm878_vm2 = vcmask 195712   ;;  %vm885_vm3 = vcmask 261312   ;;  %vm892_vm4 = vcmask 326912  }
  0x14   :  { %1063 = vmatpush3.bf16.msra.mxu0 %v1152_v0  ;;  %1066 = vmatprep.mubr.msk.bf16.mxu0 %vm114_vm0, %v1154_v2  ;;  %v1162_v5 = vld [vmem:[#allocation2] sm:$0xff]   ;;  %v1163_v6 = vld [vmem:[#allocation2 + $0x8] sm:$0xff]   ;;  %v1157_v7 = vld [vmem:[%s1394_s0 + $0x18] sm:$0xff]   ;;  %vm899_vm5 = vcmask 392512   ;;  %vm906_vm6 = vcmask 458112   ;;  %vm913_vm7 = vcmask 523712  }
  0x15   :  { %1064 = vmatprep.subr.bf16.mxu0 %v1153_v1  ;;  %1082 = vmatprep.subr.bf16.mxu1 %v1162_v5  ;;  %v1164_v8 = vld [vmem:[#allocation2 + $0x10] sm:$0xff]   ;;  %v1158_v9 = vld [vmem:[%s1394_s0 + $0x20] sm:$0xff]   ;;  %v1165_v10 = vld [vmem:[#allocation2 + $0x18] sm:$0xff]   ;;  %vm920_vm8 = vcmask 589312   ;;  %vm927_vm9 = vcmask 654912   ;;  %vm934_vm10 = vcmask 720512  }
  0x16   :  { %1083 = vmatpush3.bf16.msra.mxu1 %v1162_v5  ;;  %v1159_v11 = vld [vmem:[%s1394_s0 + $0x28] sm:$0xff]   ;;  %v1166_v12 = vld [vmem:[#allocation2 + $0x20] sm:$0xff]   ;;  %v1160_v13 = vld [vmem:[%s1394_s0 + $0x30] sm:$0xff]   ;;  %vm941_vm11 = vcmask 786112   ;;  %vm948_vm12 = vcmask 851712   ;;  %vm955_vm13 = vcmask 917312  }
  0x17   :  { %1084 = vmatprep.subr.bf16.mxu1 %v1163_v6  ;;  %v1167_v14 = vld [vmem:[#allocation2 + $0x28] sm:$0xff]   ;;  %v1161_v15 = vld [vmem:[%s1394_s0 + $0x38] sm:$0xff]   ;;  %v1168_v16 = vld [vmem:[#allocation2 + $0x30] sm:$0xff]   ;;  %vm962_vm14 = vcmask 982912   ;;  %vm969_vm15 = vcmask 1048512  }
  0x18   :  { %1065 = vmatpush3.bf16.msra.mxu0 %v1153_v1  ;;  %v1169_v17 = vld [vmem:[#allocation2 + $0x38] sm:$0xff]   ;;  %v1170_v18 = vld [vmem:[#allocation2 + $0x40] sm:$0xff]   ;;  %v1171_v19 = vld [vmem:[#allocation2 + $0x48] sm:$0xff]  }
  0x19   :  { %1114 = vmatprep.subr.bf16.mxu0 %v1170_v18  ;;  %v1172_v20 = vld [vmem:[#allocation2 + $0x50] sm:$0xff]   ;;  %v1173_v21 = vld [vmem:[#allocation2 + $0x58] sm:$0xff]   ;;  %v1174_v22 = vld [vmem:[#allocation2 + $0x60] sm:$0xff]  }
  0x1a   :  { %1085 = vmatpush3.bf16.msra.mxu1 %v1163_v6  ;;  %v1175_v23 = vld [vmem:[#allocation2 + $0x68] sm:$0xff]   ;;  %v978_v24 = vld [vmem:[%s1397_s3] ss:$0 sm:$0xff] }
  0x1b   :  { %1067 = vmatmul.mubr.msk.bf16.vlgmr.msra.gmra.mrb[0].mxu0 %vm114_vm0, %v1155_v3  ;;  %1086 = vmatprep.subr.bf16.mxu1 %v1164_v8 }
  0x1c   :  { %1070 = vmatprep.mubr.msk.bf16.mxu0 %vm114_vm0, %v1156_v4  ;;  %1115 = vmatpush3.bf16.msra.mxu0 %v1170_v18  ;;  %v1177_v18 = vld [vmem:[#allocation2 + $0x78] sm:$0xff]  }
  0x1d   :  { %1116 = vmatprep.subr.bf16.mxu0 %v1171_v19 }
  0x1e   :  { %1087 = vmatpush3.bf16.msra.mxu1 %v1164_v8 }
  0x1f   :  { %1088 = vmatprep.subr.bf16.mxu1 %v1165_v10 }
  0x20   :  { %1117 = vmatpush3.bf16.msra.mxu0 %v1171_v19  ;;  %v1292_v19 = vld [vmem:[%s1397_s3 + $0x3] ss:$0 sm:$0xff] }
  0x21   :  { %1118 = vmatprep.subr.bf16.mxu0 %v1172_v20  ;;  %706 = vbcast.lane.b32.xlu1 %v1292_v19, 264 }
  0x22   :  { %1089 = vmatpush3.bf16.msra.mxu1 %v1165_v10  ;;  %702 = vbcast.lane.b32.xlu0 %v1292_v19, 256 }
  0x23   :  { %1071 = vmatmul.mubr.msk.bf16.gmra.mrb[4].mxu0 %vm114_vm0, %v1157_v7  ;;  %1090 = vmatprep.subr.bf16.mxu1 %v1166_v12 }
  0x24   :  { %1074 = vmatprep.mubr.msk.bf16.mxu0 %vm114_vm0, %v1158_v9  ;;  %1119 = vmatpush3.bf16.msra.mxu0 %v1172_v20  ;;  %v998_v20 = vld [vmem:[%s1397_s3 + $0x1] ss:$0 sm:$0xff] }
  0x25   :  { %1120 = vmatprep.subr.bf16.mxu0 %v1173_v21  ;;  %710 = vbcast.lane.b32.xlu1 %v1292_v19, 272 }
  0x26   :  { %1091 = vmatpush3.bf16.msra.mxu1 %v1166_v12  ;;  %718 = vbcast.lane.b32.xlu0 %v1292_v19, 288 }
  0x27   :  { %1092 = vmatprep.subr.bf16.mxu1 %v1167_v14 }
  0x28   :  { %1121 = vmatpush3.bf16.msra.mxu0 %v1173_v21 }
  0x29   :  { %1122 = vmatprep.subr.bf16.mxu0 %v1174_v22  ;;  %714 = vbcast.lane.b32.xlu1 %v1292_v19, 280 }
  0x2a   :  { %1093 = vmatpush3.bf16.msra.mxu1 %v1167_v14  ;;  %726 = vbcast.lane.b32.xlu0 %v1292_v19, 304 }
  0x2b   :  { %1075 = vmatmul.mubr.msk.bf16.gmra.mrb[8].mxu0 %vm114_vm0, %v1159_v11  ;;  %1094 = vmatprep.subr.bf16.mxu1 %v1168_v16 }
  0x2c   :  { %1078 = vmatprep.mubr.msk.bf16.mxu0 %vm114_vm0, %v1160_v13  ;;  %1123 = vmatpush3.bf16.msra.mxu0 %v1174_v22 }
  0x2d   :  { %1124 = vmatprep.subr.bf16.mxu0 %v1175_v23  ;;  %722 = vbcast.lane.b32.xlu1 %v1292_v19, 296 }
  0x2e   :  { %1095 = vmatpush3.bf16.msra.mxu1 %v1168_v16  ;;  %734 = vbcast.lane.b32.xlu0 %v1292_v19, 320 }
  0x2f   :  { %1096 = vmatprep.subr.bf16.mxu1 %v1169_v17 }
  0x30   :  { %1125 = vmatpush3.bf16.msra.mxu0 %v1175_v23 }
  0x31   :  { %730 = vbcast.lane.b32.xlu1 %v1292_v19, 312 }
  0x32   :  { %1097 = vmatpush3.bf16.msra.mxu1 %v1169_v17  ;;  %v1176_v17 = vld [vmem:[#allocation2 + $0x70] sm:$0xff]   ;;  %742 = vbcast.lane.b32.xlu0 %v1292_v19, 336 }
  0x33   :  { %1079 = vmatmul.mubr.msk.bf16.gmra.mrb[12].mxu0 %vm114_vm0, %v1161_v15  ;;  %1126 = vmatprep.subr.bf16.mxu0 %v1176_v17 }
  0x34   :  { %1127 = vmatpush3.bf16.msra.mxu0 %v1176_v17 }
  0x35   :  { %1128 = vmatprep.subr.bf16.mxu0 %v1177_v18  ;;  %738 = vbcast.lane.b32.xlu1 %v1292_v19, 328 }
  0x36   :  { %750 = vbcast.lane.b32.xlu0 %v1292_v19, 352 }
  0x38   :  { %1129 = vmatpush3.bf16.msra.mxu0 %v1177_v18 }
  0x39   :  { %746 = vbcast.lane.b32.xlu1 %v1292_v19, 344 }
  0x3d   :  { %754 = vbcast.lane.b32.xlu1 %v1292_v19, 360 }
  0xee   :  { %v1068_v25 = vpop.f32.mrb[0].mxu0 }
  0xef   :  { %v182_v26 = vadd.f32 %v1068_v25, %v978_v24  ;;  %v173_v27 = vpop.f32.mrb[1].mxu0 }
  0xf0   :  { %v174_v28 = vadd.f32 %v978_v24, %v173_v27  ;;  %v1069_v29 = vpop.f32.mrb[2].mxu0 }
  0xf1   :  { %v185_v30 = vadd.f32 %v1069_v29, %v978_v24  ;;  %v176_v31 = vpop.f32.mrb[3].mxu0  ;;  %v238_v33 = vmax.f32 %v182_v26, 0.0 }
  0xf2   :  { %v177_v32 = vadd.f32 %v978_v24, %v176_v31  ;;  %v236_v35 = vmax.f32 %v174_v28, 0.0 }
  0xf3   :  { %v239_v34 = vmax.f32 %v185_v30, 0.0 }
  0xf4   :  { %v237_v36 = vmax.f32 %v177_v32, 0.0 }
  0xf5   :  { %v253_v37 = vpack.c.bf16 %v239_v34, %v238_v33 }
  0xf6   :  { %v1072_v38 = vpop.f32.mrb[4].mxu0  ;;  %v252_v39 = vpack.c.bf16 %v237_v36, %v236_v35 }
  0xf7   :  { %v198_v40 = vadd.f32 %v1072_v38, %v978_v24  ;;  %v189_v41 = vpop.f32.mrb[5].mxu0 }
  0xf8   :  { %v190_v42 = vadd.f32 %v978_v24, %v189_v41  ;;  %v1073_v43 = vpop.f32.mrb[6].mxu0  ;;  %1098 = vmatprep.mubr.bf16.mxu1 %v252_v39 }
  0xf9   :  { %v201_v44 = vadd.f32 %v1073_v43, %v978_v24  ;;  %v192_v45 = vpop.f32.mrb[7].mxu0  ;;  %1099 = vmatmul.mubr.bf16.vlgmr.msra.gmra.mrb[0].mxu1 %v253_v37  ;;  %v242_v47 = vmax.f32 %v198_v40, 0.0 }
  0xfa   :  { %v193_v46 = vadd.f32 %v978_v24, %v192_v45  ;;  %v240_v49 = vmax.f32 %v190_v42, 0.0 }
  0xfb   :  { %v243_v48 = vmax.f32 %v201_v44, 0.0 }
  0xfc   :  { %v241_v50 = vmax.f32 %v193_v46, 0.0 }
  0xfd   :  { %v255_v51 = vpack.c.bf16 %v243_v48, %v242_v47 }
  0xfe   :  { %v254_v52 = vpack.c.bf16 %v241_v50, %v240_v49  ;;  %v1076_v53 = vpop.f32.mrb[8].mxu0 }
  0xff   :  { %v214_v54 = vadd.f32 %v1076_v53, %v978_v24  ;;  %v205_v55 = vpop.f32.mrb[9].mxu0 }
 0x100   :  { %v206_v56 = vadd.f32 %v978_v24, %v205_v55  ;;  %v1077_v57 = vpop.f32.mrb[10].mxu0  ;;  %1102 = vmatprep.mubr.bf16.mxu1 %v254_v52 }
 0x101   :  { %v217_v58 = vadd.f32 %v1077_v57, %v978_v24  ;;  %v208_v59 = vpop.f32.mrb[11].mxu0  ;;  %1103 = vmatmul.mubr.bf16.gmra.mrb[4].mxu1 %v255_v51  ;;  %v246_v61 = vmax.f32 %v214_v54, 0.0 }
 0x102   :  { %v209_v60 = vadd.f32 %v978_v24, %v208_v59  ;;  %v244_v63 = vmax.f32 %v206_v56, 0.0 }
 0x103   :  { %v247_v62 = vmax.f32 %v217_v58, 0.0 }
 0x104   :  { %v245_v0 = vmax.f32 %v209_v60, 0.0 }
 0x105   :  { %v257_v1 = vpack.c.bf16 %v247_v62, %v246_v61 }
 0x106   :  { %v256_v2 = vpack.c.bf16 %v245_v0, %v244_v63  ;;  %v1080_v3 = vpop.f32.mrb[12].mxu0 }
 0x107   :  { %v230_v4 = vadd.f32 %v1080_v3, %v978_v24  ;;  %v221_v5 = vpop.f32.mrb[13].mxu0 }
 0x108   :  { %v222_v6 = vadd.f32 %v978_v24, %v221_v5  ;;  %v1081_v7 = vpop.f32.mrb[14].mxu0  ;;  %1106 = vmatprep.mubr.bf16.mxu1 %v256_v2 }
 0x109   :  { %v233_v8 = vadd.f32 %v1081_v7, %v978_v24  ;;  %v224_v9 = vpop.f32.mrb[15].mxu0  ;;  %1107 = vmatmul.mubr.bf16.gmra.mrb[8].mxu1 %v257_v1  ;;  %v250_v11 = vmax.f32 %v230_v4, 0.0 }
 0x10a   :  { %v225_v10 = vadd.f32 %v978_v24, %v224_v9  ;;  %v248_v13 = vmax.f32 %v222_v6, 0.0 }
 0x10b   :  { %v251_v12 = vmax.f32 %v233_v8, 0.0 }
 0x10c   :  { %v249_v14 = vmax.f32 %v225_v10, 0.0 }
 0x10d   :  { %v259_v15 = vpack.c.bf16 %v251_v12, %v250_v11 }
 0x10e   :  { %v258_v16 = vpack.c.bf16 %v249_v14, %v248_v13  ;;  %v1314_v13 = vld [vmem:[%s1397_s3 + $0x2] ss:$0 sm:$0xff] }
 0x110   :  { %1110 = vmatprep.mubr.bf16.mxu1 %v258_v16 }
 0x111   :  { %1111 = vmatmul.mubr.bf16.gmra.mrb[12].mxu1 %v259_v15 }
 0x1cc   :  { %v1100_v21 = vpop.f32.mrb[0].mxu1 }
 0x1cd   :  { %v375_v22 = vadd.f32 %v1100_v21, %v998_v20  ;;  %v366_v23 = vpop.f32.mrb[1].mxu1 }
 0x1ce   :  { %v367_v24 = vadd.f32 %v998_v20, %v366_v23  ;;  %v1101_v25 = vpop.f32.mrb[2].mxu1 }
 0x1cf   :  { %v378_v26 = vadd.f32 %v1101_v25, %v998_v20  ;;  %v369_v27 = vpop.f32.mrb[3].mxu1  ;;  %v431_v29 = vmax.f32 %v375_v22, 0.0 }
 0x1d0   :  { %v370_v28 = vadd.f32 %v998_v20, %v369_v27  ;;  %v429_v31 = vmax.f32 %v367_v24, 0.0 }
 0x1d1   :  { %v432_v30 = vmax.f32 %v378_v26, 0.0 }
 0x1d2   :  { %v430_v32 = vmax.f32 %v370_v28, 0.0 }
 0x1d3   :  { %v446_v33 = vpack.c.bf16 %v432_v30, %v431_v29 }
 0x1d4   :  { %v445_v34 = vpack.c.bf16 %v430_v32, %v429_v31  ;;  %v1104_v35 = vpop.f32.mrb[4].mxu1 }
 0x1d5   :  { %v391_v36 = vadd.f32 %v1104_v35, %v998_v20  ;;  %v382_v37 = vpop.f32.mrb[5].mxu1 }
 0x1d6   :  { %v383_v38 = vadd.f32 %v998_v20, %v382_v37  ;;  %v1105_v39 = vpop.f32.mrb[6].mxu1  ;;  %1130 = vmatprep.mubr.bf16.mxu0 %v445_v34 }
 0x1d7   :  { %v394_v40 = vadd.f32 %v1105_v39, %v998_v20  ;;  %v385_v41 = vpop.f32.mrb[7].mxu1  ;;  %1131 = vmatmul.mubr.bf16.vlgmr.msra.gmra.mrb[16].mxu0 %v446_v33  ;;  %v435_v43 = vmax.f32 %v391_v36, 0.0 }
 0x1d8   :  { %v386_v42 = vadd.f32 %v998_v20, %v385_v41  ;;  %v433_v45 = vmax.f32 %v383_v38, 0.0 }
 0x1d9   :  { %v436_v44 = vmax.f32 %v394_v40, 0.0 }
 0x1da   :  { %v434_v46 = vmax.f32 %v386_v42, 0.0 }
 0x1db   :  { %v448_v47 = vpack.c.bf16 %v436_v44, %v435_v43 }
 0x1dc   :  { %v447_v48 = vpack.c.bf16 %v434_v46, %v433_v45  ;;  %v1108_v49 = vpop.f32.mrb[8].mxu1 }
 0x1dd   :  { %v407_v50 = vadd.f32 %v1108_v49, %v998_v20  ;;  %v398_v51 = vpop.f32.mrb[9].mxu1 }
 0x1de   :  { %v399_v52 = vadd.f32 %v998_v20, %v398_v51  ;;  %v1109_v53 = vpop.f32.mrb[10].mxu1  ;;  %1134 = vmatprep.mubr.bf16.mxu0 %v447_v48 }
 0x1df   :  { %v410_v54 = vadd.f32 %v1109_v53, %v998_v20  ;;  %v401_v55 = vpop.f32.mrb[11].mxu1  ;;  %1135 = vmatmul.mubr.bf16.gmra.mrb[20].mxu0 %v448_v47  ;;  %v439_v57 = vmax.f32 %v407_v50, 0.0 }
 0x1e0   :  { %v402_v56 = vadd.f32 %v998_v20, %v401_v55  ;;  %v437_v59 = vmax.f32 %v399_v52, 0.0 }
 0x1e1   :  { %v440_v58 = vmax.f32 %v410_v54, 0.0 }
 0x1e2   :  { %v438_v60 = vmax.f32 %v402_v56, 0.0 }
 0x1e3   :  { %v450_v61 = vpack.c.bf16 %v440_v58, %v439_v57 }
 0x1e4   :  { %v449_v62 = vpack.c.bf16 %v438_v60, %v437_v59  ;;  %v1112_v63 = vpop.f32.mrb[12].mxu1  ;;  %v1205_v60 = vmov 0  }
 0x1e5   :  { %v423_v0 = vadd.f32 %v1112_v63, %v998_v20  ;;  %v414_v1 = vpop.f32.mrb[13].mxu1  ;;  %1150 = vset.pattern.permute.xlu1 %v1205_v60  ;;  %1151 = vset.pattern.permute.xlu0 %v1205_v60 }
 0x1e6   :  { %v415_v2 = vadd.f32 %v998_v20, %v414_v1  ;;  %v1113_v3 = vpop.f32.mrb[14].mxu1  ;;  %1138 = vmatprep.mubr.bf16.mxu0 %v449_v62 }
 0x1e7   :  { %v426_v4 = vadd.f32 %v1113_v3, %v998_v20  ;;  %v417_v5 = vpop.f32.mrb[15].mxu1  ;;  %1139 = vmatmul.mubr.bf16.gmra.mrb[24].mxu0 %v450_v61  ;;  %v443_v7 = vmax.f32 %v423_v0, 0.0 }
 0x1e8   :  { %v418_v6 = vadd.f32 %v998_v20, %v417_v5  ;;  %v441_v9 = vmax.f32 %v415_v2, 0.0  ;;  %v1321_v20 = vld [vmem:[%s1398_s4] ss:$0 sm:$0xff] }
 0x1e9   :  { %v444_v8 = vmax.f32 %v426_v4, 0.0 }
 0x1ea   :  { %v442_v10 = vmax.f32 %v418_v6, 0.0 }
 0x1eb   :  { %v452_v11 = vpack.c.bf16 %v444_v8, %v443_v7 }
 0x1ec   :  { %v451_v12 = vpack.c.bf16 %v442_v10, %v441_v9 }
 0x1ee   :  { %1142 = vmatprep.mubr.bf16.mxu0 %v451_v12 }
 0x1ef   :  { %1143 = vmatmul.mubr.bf16.gmra.mrb[28].mxu0 %v452_v11 }
 0x2aa   :  { %v1132_v14 = vpop.f32.mrb[16].mxu0 }
 0x2ab   :  { %v569_v15 = vadd.f32 %v1132_v14, %v1314_v13  ;;  %v560_v16 = vpop.f32.mrb[17].mxu0 }
 0x2ac   :  { %v561_v17 = vadd.f32 %v1314_v13, %v560_v16  ;;  %v1133_v18 = vpop.f32.mrb[18].mxu0 }
 0x2ad   :  { %v625_v21 = vmax.f32 %v569_v15, 0.0  ;;  %v572_v22 = vadd.f32 %v1133_v18, %v1314_v13  ;;  %v563_v23 = vpop.f32.mrb[19].mxu0 }
 0x2ae   :  { %v623_v24 = vmax.f32 %v561_v17, 0.0  ;;  %v564_v25 = vadd.f32 %v1314_v13, %v563_v23 }
 0x2af   :  { %v626_v26 = vmax.f32 %v572_v22, 0.0  ;;  %v648_v27 = vmul.f32 %v1321_v20, %v625_v21  ;;  %v703_v22 = vpop.permute.xlu0 %702 }
 0x2b0   :  { %v624_v28 = vmax.f32 %v564_v25, 0.0  ;;  %v646_v29 = vmul.f32 %v1321_v20, %v623_v24 }
 0x2b1   :  { %666 = vadd.xlane.f32.xlu1 %v648_v27  ;;  %v649_v33 = vmul.f32 %v1321_v20, %v626_v26 }
 0x2b2   :  { %v1136_v30 = vpop.f32.mrb[20].mxu0  ;;  %662 = vadd.xlane.f32.xlu0 %v646_v29  ;;  %v647_v36 = vmul.f32 %v1321_v20, %v624_v28 }
 0x2b3   :  { %v585_v31 = vadd.f32 %v1136_v30, %v1314_v13  ;;  %v576_v32 = vpop.f32.mrb[21].mxu0  ;;  %v719_v24 = vpop.permute.xlu0 %718 }
 0x2b4   :  { %v577_v34 = vadd.f32 %v1314_v13, %v576_v32  ;;  %v1137_v35 = vpop.f32.mrb[22].mxu0 }
 0x2b5   :  { %v629_v37 = vmax.f32 %v585_v31, 0.0  ;;  %v588_v38 = vadd.f32 %v1137_v35, %v1314_v13  ;;  %668 = vadd.xlane.f32.xlu1 %v649_v33  ;;  %v579_v39 = vpop.f32.mrb[23].mxu0 }
 0x2b6   :  { %v580_v40 = vadd.f32 %v1314_v13, %v579_v39  ;;  %664 = vadd.xlane.f32.xlu0 %v647_v36  ;;  %v627_v43 = vmax.f32 %v577_v34, 0.0 }
 0x2b7   :  { %v630_v41 = vmax.f32 %v588_v38, 0.0  ;;  %v652_v42 = vmul.f32 %v1321_v20, %v629_v37  ;;  %v727_v26 = vpop.permute.xlu0 %726 }
 0x2b8   :  { %v628_v44 = vmax.f32 %v580_v40, 0.0  ;;  %v650_v51 = vmul.f32 %v1321_v20, %v627_v43 }
 0x2b9   :  { %v653_v45 = vmul.f32 %v1321_v20, %v630_v41 }
 0x2ba   :  { %v1140_v46 = vpop.f32.mrb[24].mxu0  ;;  %674 = vadd.xlane.f32.xlu0 %v652_v42  ;;  %v651_v55 = vmul.f32 %v1321_v20, %v628_v44 }
 0x2bb   :  { %v601_v47 = vadd.f32 %v1140_v46, %v1314_v13  ;;  %676 = vadd.xlane.f32.xlu1 %v653_v45  ;;  %v592_v48 = vpop.f32.mrb[25].mxu0  ;;  %v735_v28 = vpop.permute.xlu0 %734 }
 0x2bc   :  { %v593_v49 = vadd.f32 %v1314_v13, %v592_v48  ;;  %v1141_v50 = vpop.f32.mrb[26].mxu0 }
 0x2bd   :  { %v633_v52 = vmax.f32 %v601_v47, 0.0  ;;  %v604_v53 = vadd.f32 %v1141_v50, %v1314_v13  ;;  %v595_v54 = vpop.f32.mrb[27].mxu0 }
 0x2be   :  { %v596_v56 = vadd.f32 %v1314_v13, %v595_v54  ;;  %670 = vadd.xlane.f32.xlu0 %v650_v51  ;;  %v631_v59 = vmax.f32 %v593_v49, 0.0 }
 0x2bf   :  { %v634_v57 = vmax.f32 %v604_v53, 0.0  ;;  %672 = vadd.xlane.f32.xlu1 %v651_v55  ;;  %v656_v58 = vmul.f32 %v1321_v20, %v633_v52  ;;  %v743_v30 = vpop.permute.xlu0 %742 }
 0x2c0   :  { %v632_v61 = vmax.f32 %v596_v56, 0.0  ;;  %v654_v4 = vmul.f32 %v1321_v20, %v631_v59 }
 0x2c1   :  { %v657_v62 = vmul.f32 %v1321_v20, %v634_v57 }
 0x2c2   :  { %v1144_v63 = vpop.f32.mrb[28].mxu0  ;;  %682 = vadd.xlane.f32.xlu0 %v656_v58  ;;  %v655_v8 = vmul.f32 %v1321_v20, %v632_v61 }
 0x2c3   :  { %v617_v0 = vadd.f32 %v1144_v63, %v1314_v13  ;;  %v608_v1 = vpop.f32.mrb[29].mxu0  ;;  %684 = vadd.xlane.f32.xlu1 %v657_v62 }
 0x2c4   :  { %v609_v2 = vadd.f32 %v1314_v13, %v608_v1  ;;  %v1145_v3 = vpop.f32.mrb[30].mxu0  ;;  %v860_v1 = vlaneseq }
 0x2c5   :  { %v637_v5 = vmax.f32 %v617_v0, 0.0  ;;  %v620_v6 = vadd.f32 %v1145_v3, %v1314_v13  ;;  %v611_v7 = vpop.f32.mrb[31].mxu0 }
 0x2c6   :  { %v612_v9 = vadd.f32 %v1314_v13, %v611_v7  ;;  %678 = vadd.xlane.f32.xlu0 %v654_v4  ;;  %v635_v12 = vmax.f32 %v609_v2, 0.0  ;;  %v707_v13 = vpop.permute.xlu1 %706  ;;  %v1355_v2 = vand.u32 127, %v860_v1  ;;  %v1358_v4 = vshrl.u32 %v860_v1, 7 }
 0x2c7   :  { %v638_v10 = vmax.f32 %v620_v6, 0.0  ;;  %680 = vadd.xlane.f32.xlu1 %v655_v8  ;;  %v660_v11 = vmul.f32 %v1321_v20, %v637_v5 }
 0x2c8   :  { %v636_v14 = vmax.f32 %v612_v9, 0.0  ;;  %v658_v16 = vmul.f32 %v1321_v20, %v635_v12  ;;  %v866_v3 = vadd.s32 4294967288, %v1355_v2  ;;  %v873_v7 = vadd.s32 4294967280, %v1355_v2 }
 0x2c9   :  { %v661_v15 = vmul.f32 %v1321_v20, %v638_v10  ;;  %v864_v9 = vsub.s32 %v1355_v2, %v1358_v4 }
 0x2ca   :  { %690 = vadd.xlane.f32.xlu0 %v660_v11  ;;  %v659_v17 = vmul.f32 %v1321_v20, %v636_v14  ;;  %v711_v18 = vpop.permute.xlu1 %710  ;;  %v751_v20 = vpop.permute.xlu0 %750  ;;  %v869_v8 = vsub.s32 %v866_v3, %v1358_v4  ;;  %v880_v11 = vadd.s32 4294967272, %v1355_v2  ;;  %v876_v14 = vsub.s32 %v873_v7, %v1358_v4 }
 0x2cb   :  { %692 = vadd.xlane.f32.xlu1 %v661_v15 }
 0x2ce   :  { %686 = vadd.xlane.f32.xlu0 %v658_v16  ;;  %v715_v21 = vpop.permute.xlu1 %714  ;;  %v887_v16 = vadd.s32 4294967264, %v1355_v2 }
 0x2cf   :  { %688 = vadd.xlane.f32.xlu1 %v659_v17 }
 0x2d2   :  { %v723_v23 = vpop.permute.xlu1 %722 }
 0x2d6   :  { %v731_v25 = vpop.permute.xlu1 %730 }
 0x2da   :  { %v739_v27 = vpop.permute.xlu1 %738 }
 0x2de   :  { %v747_v29 = vpop.permute.xlu1 %746 }
 0x2e0   :  { %762 = vbcast.lane.b32.xlu1 %v1292_v19, 376 }
 0x2e2   :  { %v755_v31 = vpop.permute.xlu1 %754 }
 0x2e4   :  { %758 = vbcast.lane.b32.xlu0 %v1292_v19, 368 }
 0x33e   :  { %v667_v32 = vpop.xlane.xlu1 %666 }
 0x33f   :  { %v782_v33 = vadd.f32 %v711_v18, %v667_v32  ;;  %v663_v34 = vpop.xlane.xlu0 %662 }
 0x340   :  { %v780_v35 = vadd.f32 %v703_v22, %v663_v34  ;;  %v915_v34 = vadd.s32 4294967232, %v1355_v2 }
 0x341   :  { %819 = vperm.xlu1 %1150, %v782_v33  }
 0x342   :  { %v669_v19 = vpop.xlane.xlu1 %668  ;;  %813 = vperm.xlu0 %1151, %v780_v35  }
 0x343   :  { %v783_v36 = vadd.f32 %v715_v21, %v669_v19  ;;  %v665_v37 = vpop.xlane.xlu0 %664  ;;  %v883_v21 = vsub.s32 %v880_v11, %v1358_v4 }
 0x344   :  { %v781_v38 = vadd.f32 %v707_v13, %v665_v37  ;;  %v894_v13 = vadd.s32 4294967256, %v1355_v2 }
 0x346   :  { %822 = vperm.xlu0 %1151, %v783_v36   ;;  %816 = vperm.xlu1 %1150, %v781_v38   ;;  %v922_v36 = vadd.s32 4294967224, %v1355_v2 }
 0x347   :  { %v675_v39 = vpop.xlane.xlu0 %674 }
 0x348   :  { %v786_v40 = vadd.f32 %v727_v26, %v675_v39  ;;  %v677_v41 = vpop.xlane.xlu1 %676  ;;  %v890_v26 = vsub.s32 %v887_v16, %v1358_v4 }
 0x349   :  { %v787_v42 = vadd.f32 %v731_v25, %v677_v41 }
 0x34a   :  { %831 = vperm.xlu1 %1150, %v786_v40  }
 0x34b   :  { %834 = vperm.xlu0 %1151, %v787_v42   ;;  %v671_v43 = vpop.xlane.xlu0 %670  ;;  %v929_v42 = vadd.s32 4294967216, %v1355_v2 }
 0x34c   :  { %v784_v44 = vadd.f32 %v719_v24, %v671_v43  ;;  %v673_v45 = vpop.xlane.xlu1 %672  ;;  %v901_v24 = vadd.s32 4294967248, %v1355_v2 }
 0x34d   :  { %v785_v46 = vadd.f32 %v723_v23, %v673_v45  ;;  %v925_v45 = vsub.s32 %v922_v36, %v1358_v4 }
 0x34e   :  { %825 = vperm.xlu1 %1150, %v784_v44   ;;  %v918_v44 = vsub.s32 %v915_v34, %v1358_v4 }
 0x34f   :  { %828 = vperm.xlu0 %1151, %v785_v46   ;;  %v683_v47 = vpop.xlane.xlu0 %682 }
 0x350   :  { %v790_v48 = vadd.f32 %v743_v30, %v683_v47  ;;  %v685_v49 = vpop.xlane.xlu1 %684  ;;  %v908_v30 = vadd.s32 4294967240, %v1355_v2 }
 0x351   :  { %v791_v50 = vadd.f32 %v747_v29, %v685_v49 }
 0x352   :  { %843 = vperm.xlu1 %1150, %v790_v48   ;;  %v911_v38 = vsub.s32 %v908_v30, %v1358_v4  ;;  %v936_v48 = vadd.s32 4294967208, %v1355_v2 }
 0x353   :  { %846 = vperm.xlu0 %1151, %v791_v50   ;;  %v679_v51 = vpop.xlane.xlu0 %678  ;;  %v932_v50 = vsub.s32 %v929_v42, %v1358_v4 }
 0x354   :  { %v788_v52 = vadd.f32 %v735_v28, %v679_v51  ;;  %v681_v53 = vpop.xlane.xlu1 %680 }
 0x355   :  { %v789_v54 = vadd.f32 %v739_v27, %v681_v53  ;;  %v897_v27 = vsub.s32 %v894_v13, %v1358_v4  ;;  %v943_v53 = vadd.s32 4294967200, %v1355_v2 }
 0x356   :  { %837 = vperm.xlu1 %1150, %v788_v52  }
 0x357   :  { %840 = vperm.xlu0 %1151, %v789_v54   ;;  %v691_v55 = vpop.xlane.xlu0 %690 }
 0x358   :  { %v693_v56 = vpop.xlane.xlu1 %692 }
 0x35b   :  { %v687_v57 = vpop.xlane.xlu0 %686 }
 0x35c   :  { %v792_v58 = vadd.f32 %v751_v20, %v687_v57  ;;  %v689_v59 = vpop.xlane.xlu1 %688  ;;  %v904_v20 = vsub.s32 %v901_v24, %v1358_v4 }
 0x35d   :  { %v793_v60 = vadd.f32 %v755_v31, %v689_v59 }
 0x35e   :  { %849 = vperm.xlu1 %1150, %v792_v58   ;;  %v939_v58 = vsub.s32 %v936_v48, %v1358_v4 }
 0x35f   :  { %852 = vperm.xlu0 %1151, %v793_v60   ;;  %v759_v61 = vpop.permute.xlu0 %758 }
 0x360   :  { %v794_v62 = vadd.f32 %v759_v61, %v691_v55  ;;  %v763_v63 = vpop.permute.xlu1 %762  ;;  %v946_v61 = vsub.s32 %v943_v53, %v1358_v4 }
 0x361   :  { %v795_v0 = vadd.f32 %v763_v63, %v693_v56  ;;  %v950_v56 = vadd.s32 4294967192, %v1355_v2 }
 0x362   :  { %855 = vperm.xlu1 %1150, %v794_v62   ;;  %v957_v62 = vadd.s32 4294967184, %v1355_v2 }
 0x363   :  { %858 = vperm.xlu0 %1151, %v795_v0   ;;  %v953_v63 = vsub.s32 %v950_v56, %v1358_v4  ;;  %v964_v0 = vadd.s32 4294967176, %v1355_v2 }
 0x365   :  { %v967_v11 = vsub.s32 %v964_v0, %v1358_v4 }
 0x3c0   :  { %v820_v5 = vpop.permute.xlu1 %819 }
 0x3c1   :  { %v814_v6 = vpop.permute.xlu0 %813  ;;  %v877_v23 = vrot.slane %v820_v5, %v876_v14 }
 0x3c2   :  { %v865_v17 = vrot.slane %v814_v6, %v864_v9 }
 0x3c5   :  { %v817_v10 = vpop.permute.xlu1 %816  ;;  %v823_v12 = vpop.permute.xlu0 %822 }
 0x3c6   :  { %v870_v15 = vrot.slane %v817_v10, %v869_v8  ;;  %v884_v29 = vrot.slane %v823_v12, %v883_v21  ;;  %v960_v8 = vsub.s32 %v957_v62, %v1358_v4 }
 0x3c8   :  { %v872_v18 = vsel %vm871_vm1, %v870_v15, %v865_v17 }
 0x3c9   :  { %v832_v22 = vpop.permute.xlu1 %831  ;;  %v879_v28 = vsel %vm878_vm2, %v877_v23, %v872_v18 }
 0x3ca   :  { %v835_v25 = vpop.permute.xlu0 %834  ;;  %v886_v35 = vsel %vm885_vm3, %v884_v29, %v879_v28  ;;  %v905_v41 = vrot.slane %v832_v22, %v904_v20 }
 0x3cb   :  { %v912_v47 = vrot.slane %v835_v25, %v911_v38 }
 0x3cd   :  { %v826_v31 = vpop.permute.xlu1 %825 }
 0x3ce   :  { %v891_v32 = vrot.slane %v826_v31, %v890_v26  ;;  %v829_v33 = vpop.permute.xlu0 %828 }
 0x3cf   :  { %v898_v19 = vrot.slane %v829_v33, %v897_v27 }
 0x3d0   :  { %v893_v37 = vsel %vm892_vm4, %v891_v32, %v886_v35 }
 0x3d1   :  { %v900_v39 = vsel %vm899_vm5, %v898_v19, %v893_v37  ;;  %v844_v40 = vpop.permute.xlu1 %843 }
 0x3d2   :  { %v847_v43 = vpop.permute.xlu0 %846  ;;  %v907_v46 = vsel %vm906_vm6, %v905_v41, %v900_v39  ;;  %v933_v60 = vrot.slane %v844_v40, %v932_v50 }
 0x3d3   :  { %v914_v54 = vsel %vm913_vm7, %v912_v47, %v907_v46  ;;  %v940_v3 = vrot.slane %v847_v43, %v939_v58 }
 0x3d5   :  { %v838_v49 = vpop.permute.xlu1 %837 }
 0x3d6   :  { %v919_v51 = vrot.slane %v838_v49, %v918_v44  ;;  %v841_v52 = vpop.permute.xlu0 %840 }
 0x3d7   :  { %v926_v55 = vrot.slane %v841_v52, %v925_v45 }
 0x3d8   :  { %v921_v57 = vsel %vm920_vm8, %v919_v51, %v914_v54 }
 0x3d9   :  { %v928_v59 = vsel %vm927_vm9, %v926_v55, %v921_v57 }
 0x3da   :  { %v935_v1 = vsel %vm934_vm10, %v933_v60, %v928_v59 }
 0x3db   :  { %v942_v9 = vsel %vm941_vm11, %v940_v3, %v935_v1 }
 0x3dd   :  { %v850_v5 = vpop.permute.xlu1 %849 }
 0x3de   :  { %v947_v6 = vrot.slane %v850_v5, %v946_v61  ;;  %v853_v7 = vpop.permute.xlu0 %852 }
 0x3df   :  { %v954_v10 = vrot.slane %v853_v7, %v953_v63 }
 0x3e0   :  { %v949_v12 = vsel %vm948_vm12, %v947_v6, %v942_v9 }
 0x3e1   :  { %v856_v14 = vpop.permute.xlu1 %855  ;;  %v956_v16 = vsel %vm955_vm13, %v954_v10, %v949_v12 }
 0x3e2   :  { %v961_v15 = vrot.slane %v856_v14, %v960_v8  ;;  %v859_v2 = vpop.permute.xlu0 %858 }
 0x3e3   :  { %v968_v17 = vrot.slane %v859_v2, %v967_v11 }
 0x3e4   :  { %v963_v13 = vsel %vm962_vm14, %v961_v15, %v956_v16 }
 0x3e5   :  { %v970_v18 = vsel %vm969_vm15, %v968_v17, %v963_v13 }
 0x3e6   :  { %972 = vst [vmem:[%s1399_s5] sm:$0x1] %v970_v18 }
 0x3e7   :  { %977 = vsyncpa [#allocation3], 1 }

</bundles_post_ra>
